<compile_context>
chip_gen: v5e
topology: v5e:2x2
jax: 0.10.0
libtpu: 0.0.40
codegen_flags: <defaults>
</compile_context>

<pallas_src>
import functools

import jax
import jax.numpy as jnp
from jax.experimental import pallas as pl
from jax.experimental.pallas import tpu as pltpu


def construction_embedding_kernel(rows_ref, w_ref, out_ref, *, Bb):
    """rows_ref: [R, 3] = [x, y, valid] per output row, slot-major per block.
    w_ref: [9, D] folded weights:
      rows 0-2: wc1_x, wc1_y, bc1   (first slot,  W1∘coord_embedding)
      rows 3-5: wc2_x, wc2_y, bc2   (last slot,   W2∘coord_embedding)
      rows 6-8: wc_x,  wc_y,  bc    (candidates,  coord_embedding)
    out_ref: [R, D]."""
    rows = rows_ref[...]                                   # [R, 3] f32
    w = w_ref[...]                                         # [9, D] f32

    # first slot: rows [0, Bb)
    xf = rows[0:Bb, 0:1]
    yf = rows[0:Bb, 1:2]
    out_ref[0:Bb, :] = xf * w[0:1, :] + yf * w[1:2, :] + w[2:3, :]

    # last slot: rows [Bb, 2*Bb)
    xl = rows[Bb:2 * Bb, 0:1]
    yl = rows[Bb:2 * Bb, 1:2]
    out_ref[Bb:2 * Bb, :] = xl * w[3:4, :] + yl * w[4:5, :] + w[5:6, :]

    # candidate slots: rows [2*Bb, R); invalid rows have x=y=valid=0 -> zeros
    xc = rows[2 * Bb:, 0:1]
    yc = rows[2 * Bb:, 1:2]
    vc = rows[2 * Bb:, 2:3]
    out_ref[2 * Bb:, :] = xc * w[6:7, :] + yc * w[7:8, :] + vc * w[8:9, :]


def prepare_params(params):
    """One-time layout prep (hoisted out of the forward): fold W1/W2 into the
    coord Linear and pack everything into one [9, D] weight tile."""
    wc_t = params["wc"].T                                   # [2, D]
    w1_t = params["w1"].T                                   # [D, D]
    w2_t = params["w2"].T                                   # [D, D]
    wc1_t = wc_t @ w1_t                                     # [2, D]
    bc1 = params["bc"] @ w1_t + params["b1"]                # [D]
    wc2_t = wc_t @ w2_t                                     # [2, D]
    bc2 = params["bc"] @ w2_t + params["b2"]                # [D]
    w = jnp.stack(
        [wc1_t[0], wc1_t[1], bc1,
         wc2_t[0], wc2_t[1], bc2,
         wc_t[0], wc_t[1], params["bc"]], axis=0).astype(jnp.float32)  # [9, D]
    return {"w": w}


def construction_embedding(nodes, first_node_idx, last_node_idx,
                           candidate_indices, prep, block_batch=32):
    """Pallas-backed forward. Returns [B, 2+k, D] float32."""
    B, N, _ = nodes.shape
    k = candidate_indices.shape[1]
    S = 2 + k
    D = prep["w"].shape[1]

    # Batch blocking. Default gives >=2 grid steps for B>=2*block_batch so
    # v7x megacore (dimension_semantics="parallel") has work for both TCs;
    # a single block (block_batch=B) is marginally better on v5e/v6e.
    Bb = min(block_batch, B)
    if Bb >= 8:
        Bb = (Bb // 8) * 8          # sublane-aligned slab boundaries
    num_blocks = -(-B // Bb)
    Bp = num_blocks * Bb
    R = Bb * S

    # Compact valid candidate indices to the front of each row (mirrors the
    # per-batch python loop of the torch module); invalid slots stay -1.
    valid = candidate_indices != -1
    order = jnp.argsort(jnp.logical_not(valid), axis=1, stable=True)
    compacted = jnp.take_along_axis(candidate_indices, order, axis=1)
    compacted = jnp.where(
        jnp.arange(k)[None, :] < valid.sum(axis=1, keepdims=True),
        compacted, -1)

    # Gather the raw 2-wide coordinates for every output row (tiny, done once
    # in the wrapper -> no Bb^2 one-hot inside the kernel).
    batch_ar = jnp.arange(B)
    first_xy = nodes[batch_ar, first_node_idx]                      # [B, 2]
    last_xy = nodes[batch_ar, last_node_idx]                        # [B, 2]
    safe = jnp.maximum(compacted, 0)
    cand_xy = jnp.take_along_axis(
        nodes, jnp.broadcast_to(safe[:, :, None], (B, k, 2)), axis=1)  # [B,k,2]
    cand_valid = (compacted != -1).astype(jnp.float32)               # [B, k]
    cand_xy = cand_xy * cand_valid[:, :, None]                       # zero invalid

    ones = jnp.ones((B, 1, 1), jnp.float32)
    first_rows = jnp.concatenate([first_xy[:, None, :], ones], axis=-1)  # [B,1,3]
    last_rows = jnp.concatenate([last_xy[:, None, :], ones], axis=-1)    # [B,1,3]
    cand_rows = jnp.concatenate([cand_xy, cand_valid[:, :, None]], axis=-1)
    rows_all = jnp.concatenate([first_rows, last_rows, cand_rows],
                               axis=1).astype(jnp.float32)           # [B, S, 3]
    if Bp > B:
        rows_all = jnp.pad(rows_all, ((0, Bp - B), (0, 0), (0, 0)))

    # Rearrange to slot-major layout inside each block of Bb batches.
    rows_blk = rows_all.reshape(num_blocks, Bb, S, 3)
    rows_in = jnp.concatenate(
        [rows_blk[:, :, 0, :],                                   # first  [nb,Bb,3]
         rows_blk[:, :, 1, :],                                   # last   [nb,Bb,3]
         rows_blk[:, :, 2:, :].reshape(num_blocks, Bb * k, 3)],  # cand   [nb,Bb*k,3]
        axis=1).reshape(num_blocks * R, 3)

    grid_spec = pltpu.PrefetchScalarGridSpec(
        num_scalar_prefetch=0,
        grid=(num_blocks,),
        in_specs=[
            pl.BlockSpec((R, 3), lambda i: (i, 0)),   # per-row [x, y, valid]
            pl.BlockSpec((9, D), lambda i: (0, 0)),   # folded weights (resident)
        ],
        out_specs=pl.BlockSpec((R, D), lambda i: (i, 0)),
    )

    out_flat = pl.pallas_call(
        functools.partial(construction_embedding_kernel, Bb=Bb),
        out_shape=jax.ShapeDtypeStruct((num_blocks * R, D), jnp.float32),
        grid_spec=grid_spec,
        compiler_params=pltpu.CompilerParams(
            dimension_semantics=("parallel",)),
    )(rows_in, prep["w"])

    # Undo the slot-major block layout (free reshapes / small concat).
    out_blk = out_flat.reshape(num_blocks, R, D)
    first = out_blk[:, :Bb][:, :, None, :]                       # [nb, Bb, 1, D]
    last = out_blk[:, Bb:2 * Bb][:, :, None, :]                  # [nb, Bb, 1, D]
    cand = out_blk[:, 2 * Bb:].reshape(num_blocks, Bb, k, D)     # [nb, Bb, k, D]
    out = jnp.concatenate([first, last, cand], axis=2).reshape(Bp, S, D)
    return out[:B]


def reference(nodes, first_node_idx, last_node_idx, candidate_indices, params):
    """Pure-JAX reference reproducing the torch forward (tsp branch),
    with the original (unfused) summation order."""
    B, N, _ = nodes.shape
    k = candidate_indices.shape[1]
    emb = nodes @ params["wc"].T + params["bc"]              # [B, N, D]
    D = emb.shape[-1]

    batch_ar = jnp.arange(B)
    first_emb = emb[batch_ar, first_node_idx] @ params["w1"].T + params["b1"]
    last_emb = emb[batch_ar, last_node_idx] @ params["w2"].T + params["b2"]

    valid = candidate_indices != -1
    order = jnp.argsort(jnp.logical_not(valid), axis=1, stable=True)
    compacted = jnp.take_along_axis(candidate_indices, order, axis=1)
    compacted = jnp.where(
        jnp.arange(k)[None, :] < valid.sum(axis=1, keepdims=True), compacted, -1)
    safe = jnp.maximum(compacted, 0)
    cand_emb = jnp.take_along_axis(
        emb, jnp.broadcast_to(safe[:, :, None], (B, k, D)), axis=1)
    cand_emb = jnp.where(compacted[:, :, None] >= 0, cand_emb, 0.0)

    return jnp.concatenate(
        [first_emb[:, None, :], last_emb[:, None, :], cand_emb], axis=1)


def init_params(key, D):
    """Deterministic Linear params (PyTorch-style uniform ±1/sqrt(fan_in))."""
    ks = jax.random.split(key, 6)

    def lin(kw, kb, fan_in, fan_out):
        bound = 1.0 / jnp.sqrt(fan_in)
        w = jax.random.uniform(kw, (fan_out, fan_in), jnp.float32, -bound, bound)
        b = jax.random.uniform(kb, (fan_out,), jnp.float32, -bound, bound)
        return w, b

    wc, bc = lin(ks[0], ks[1], 2, D)
    w1, b1 = lin(ks[2], ks[3], D, D)
    w2, b2 = lin(ks[4], ks[5], D, D)
    return {"wc": wc, "bc": bc, "w1": w1, "b1": b1, "w2": w2, "b2": b2}


if __name__ == "__main__":
    B, N, k, D = 64, 16, 8, 128   # embedding_dim = 128 (module default)

    key = jax.random.PRNGKey(0)
    k_param, k_nodes, k_first, k_last, k_cand = jax.random.split(key, 5)

    params = init_params(k_param, D)
    nodes = jax.random.uniform(k_nodes, (B, N, 2), jnp.float32)
    first_node_idx = jax.random.randint(k_first, (B,), 0, N, jnp.int32)
    last_node_idx = jax.random.randint(k_last, (B,), 0, N, jnp.int32)
    candidate_indices = jax.random.randint(k_cand, (B, k), 0, N, jnp.int32)
    # sprinkle a few invalid (-1) candidates, interspersed
    candidate_indices = candidate_indices.at[0, 3].set(-1)
    candidate_indices = candidate_indices.at[0, 6].set(-1)
    candidate_indices = candidate_indices.at[1, 0].set(-1)
    candidate_indices = candidate_indices.at[17, 5].set(-1)
    candidate_indices = candidate_indices.at[33, 2].set(-1)

    prep = prepare_params(params)   # one-time weight folding (hoisted)

    fwd = jax.jit(construction_embedding, static_argnames=("block_batch",))
    out = fwd(nodes, first_node_idx, last_node_idx, candidate_indices, prep)
    out = jax.block_until_ready(out)

    ref = reference(nodes, first_node_idx, last_node_idx,
                    candidate_indices, params)
    assert out.shape == (B, 2 + k, D)
    assert jnp.allclose(out, ref, atol=1e-4, rtol=1e-4), "mismatch vs reference"
    print("KERNEL_OK")
</pallas_src>

<mosaic_0001>
module attributes {stable_mosaic.version = 11 : i64} {
  func.func @construction_embedding_kernel(%arg0: i32, %arg1: memref<320x3xf32, #tpu.memory_space<vmem>>, %arg2: memref<9x128xf32, #tpu.memory_space<vmem>>, %arg3: memref<320x128xf32, #tpu.memory_space<vmem>>) attributes {dimension_semantics = [#tpu.dimension_semantics<parallel>], iteration_bounds = array<i64: 2>, scalar_prefetch = 0 : i64, scratch_operands = 0 : i64, tpu.core_type = #tpu.core_type<tc>, window_params = [{transform_indices = @transform_0, window_bounds = array<i64: 320, 3>}, {pipeline_mode = #tpu.pipeline_mode<synchronous>, transform_indices = @transform_1, window_bounds = array<i64: 9, 128>}, {transform_indices = @transform_2, window_bounds = array<i64: 320, 128>}]} {
    %c0 = arith.constant 0 : index
    %c0_0 = arith.constant 0 : index
    %0 = vector.load %arg1[%c0, %c0_0] : memref<320x3xf32, #tpu.memory_space<vmem>>, vector<320x3xf32>
    %c0_1 = arith.constant 0 : index
    %c0_2 = arith.constant 0 : index
    %1 = vector.load %arg2[%c0_1, %c0_2] : memref<9x128xf32, #tpu.memory_space<vmem>>, vector<9x128xf32>
    %2 = vector.extract_strided_slice %0 {offsets = [0, 0], sizes = [32, 1], strides = [1, 1]} : vector<320x3xf32> to vector<32x1xf32>
    %3 = vector.extract_strided_slice %0 {offsets = [0, 1], sizes = [32, 1], strides = [1, 1]} : vector<320x3xf32> to vector<32x1xf32>
    %4 = vector.extract_strided_slice %1 {offsets = [0, 0], sizes = [1, 128], strides = [1, 1]} : vector<9x128xf32> to vector<1x128xf32>
    %5 = vector.broadcast %2 : vector<32x1xf32> to vector<32x128xf32>
    %6 = vector.broadcast %4 : vector<1x128xf32> to vector<32x128xf32>
    %7 = arith.mulf %5, %6 : vector<32x128xf32>
    %8 = vector.extract_strided_slice %1 {offsets = [1, 0], sizes = [1, 128], strides = [1, 1]} : vector<9x128xf32> to vector<1x128xf32>
    %9 = vector.broadcast %3 : vector<32x1xf32> to vector<32x128xf32>
    %10 = vector.broadcast %8 : vector<1x128xf32> to vector<32x128xf32>
    %11 = arith.mulf %9, %10 : vector<32x128xf32>
    %12 = arith.addf %7, %11 : vector<32x128xf32>
    %13 = vector.extract_strided_slice %1 {offsets = [2, 0], sizes = [1, 128], strides = [1, 1]} : vector<9x128xf32> to vector<1x128xf32>
    %14 = vector.broadcast %13 : vector<1x128xf32> to vector<32x128xf32>
    %15 = arith.addf %12, %14 : vector<32x128xf32>
    %c0_3 = arith.constant 0 : index
    %c0_4 = arith.constant 0 : index
    %16 = vector.load %arg3[%c0_3, %c0_4] : memref<320x128xf32, #tpu.memory_space<vmem>>, vector<32x128xf32>
    tpu.vector_store %arg3[%c0_3, %c0_4], %15 {strides = array<i32>} : memref<320x128xf32, #tpu.memory_space<vmem>>, vector<32x128xf32>,
    %17 = vector.extract_strided_slice %0 {offsets = [32, 0], sizes = [32, 1], strides = [1, 1]} : vector<320x3xf32> to vector<32x1xf32>
    %18 = vector.extract_strided_slice %0 {offsets = [32, 1], sizes = [32, 1], strides = [1, 1]} : vector<320x3xf32> to vector<32x1xf32>
    %19 = vector.extract_strided_slice %1 {offsets = [3, 0], sizes = [1, 128], strides = [1, 1]} : vector<9x128xf32> to vector<1x128xf32>
    %20 = vector.broadcast %17 : vector<32x1xf32> to vector<32x128xf32>
    %21 = vector.broadcast %19 : vector<1x128xf32> to vector<32x128xf32>
    %22 = arith.mulf %20, %21 : vector<32x128xf32>
    %23 = vector.extract_strided_slice %1 {offsets = [4, 0], sizes = [1, 128], strides = [1, 1]} : vector<9x128xf32> to vector<1x128xf32>
    %24 = vector.broadcast %18 : vector<32x1xf32> to vector<32x128xf32>
    %25 = vector.broadcast %23 : vector<1x128xf32> to vector<32x128xf32>
    %26 = arith.mulf %24, %25 : vector<32x128xf32>
    %27 = arith.addf %22, %26 : vector<32x128xf32>
    %28 = vector.extract_strided_slice %1 {offsets = [5, 0], sizes = [1, 128], strides = [1, 1]} : vector<9x128xf32> to vector<1x128xf32>
    %29 = vector.broadcast %28 : vector<1x128xf32> to vector<32x128xf32>
    %30 = arith.addf %27, %29 : vector<32x128xf32>
    %c32 = arith.constant 32 : index
    %c0_5 = arith.constant 0 : index
    %31 = vector.load %arg3[%c32, %c0_5] : memref<320x128xf32, #tpu.memory_space<vmem>>, vector<32x128xf32>
    tpu.vector_store %arg3[%c32, %c0_5], %30 {strides = array<i32>} : memref<320x128xf32, #tpu.memory_space<vmem>>, vector<32x128xf32>,
    %32 = vector.extract_strided_slice %0 {offsets = [64, 0], sizes = [256, 1], strides = [1, 1]} : vector<320x3xf32> to vector<256x1xf32>
    %33 = vector.extract_strided_slice %0 {offsets = [64, 1], sizes = [256, 1], strides = [1, 1]} : vector<320x3xf32> to vector<256x1xf32>
    %34 = vector.extract_strided_slice %0 {offsets = [64, 2], sizes = [256, 1], strides = [1, 1]} : vector<320x3xf32> to vector<256x1xf32>
    %35 = vector.extract_strided_slice %1 {offsets = [6, 0], sizes = [1, 128], strides = [1, 1]} : vector<9x128xf32> to vector<1x128xf32>
    %36 = vector.broadcast %32 : vector<256x1xf32> to vector<256x128xf32>
    %37 = vector.broadcast %35 : vector<1x128xf32> to vector<256x128xf32>
    %38 = arith.mulf %36, %37 : vector<256x128xf32>
    %39 = vector.extract_strided_slice %1 {offsets = [7, 0], sizes = [1, 128], strides = [1, 1]} : vector<9x128xf32> to vector<1x128xf32>
    %40 = vector.broadcast %33 : vector<256x1xf32> to vector<256x128xf32>
    %41 = vector.broadcast %39 : vector<1x128xf32> to vector<256x128xf32>
    %42 = arith.mulf %40, %41 : vector<256x128xf32>
    %43 = arith.addf %38, %42 : vector<256x128xf32>
    %44 = vector.extract_strided_slice %1 {offsets = [8, 0], sizes = [1, 128], strides = [1, 1]} : vector<9x128xf32> to vector<1x128xf32>
    %45 = vector.broadcast %34 : vector<256x1xf32> to vector<256x128xf32>
    %46 = vector.broadcast %44 : vector<1x128xf32> to vector<256x128xf32>
    %47 = arith.mulf %45, %46 : vector<256x128xf32>
    %48 = arith.addf %43, %47 : vector<256x128xf32>
    %c64 = arith.constant 64 : index
    %c0_6 = arith.constant 0 : index
    %49 = vector.load %arg3[%c64, %c0_6] : memref<320x128xf32, #tpu.memory_space<vmem>>, vector<256x128xf32>
    tpu.vector_store %arg3[%c64, %c0_6], %48 {strides = array<i32>} : memref<320x128xf32, #tpu.memory_space<vmem>>, vector<256x128xf32>,
    return
  }
  func.func @transform_0(%arg0: i32) -> (i32, i32) {
    %c0_i32 = arith.constant 0 : i32
    %c0_i32_0 = arith.constant 0 : i32
    return %arg0, %c0_i32 : i32, i32
  }
  func.func @transform_1(%arg0: i32) -> (i32, i32) {
    %c0_i32 = arith.constant 0 : i32
    %c0_i32_0 = arith.constant 0 : i32
    %c0_i32_1 = arith.constant 0 : i32
    return %c0_i32, %c0_i32_0 : i32, i32
  }
  func.func @transform_2(%arg0: i32) -> (i32, i32) {
    %c0_i32 = arith.constant 0 : i32
    %c0_i32_0 = arith.constant 0 : i32
    return %arg0, %c0_i32 : i32, i32
  }
}

</mosaic_0001>

<bundles_post_ra>
// kernel: construction_embedding.1
= control target key start
LH: loop header
LB: loop body
LE: loop exit
PB: predicated region body
PF: predicated region fallthrough
CT: control target
= control target key end

     0   :  { %s1037_s9 = smov 0   ;;  %s1647_s0 = inlined_call_operand.vmem [shape: f32[640,3], index: 0, kind: input, shape index: {}]   ;;  %s1648_s1 = inlined_call_operand.vmem [shape: f32[9,128], index: 1, kind: input, shape index: {}]   ;;  %s1649_s2 = inlined_call_operand.vmem [shape: f32[640,128], index: 2, kind: output, shape index: {}]  }
   0x1 LB: > { %s974_s10 = sadd.s32 4294967295, %s1017_s9   ;;  %p978_p0 = scmp.ge.s32.totalorder %s1017_s9, 1  ;;  %s1017_s9 = sphi %s1037_s9, %s12_s9  }
   0x2   : > { %p113_p1 = scmp.lt.s32.totalorder %s1017_s9, 3 }
   0x4   : > { %p114_p2 = pnand %p978_p0, %p113_p1 }
   0x6   : > { %117 = sbr.rel (%p114_p2) target bundleno = 449 (0x1c1), region = 28 }
   0xb   : > { %s135_s11 = smul.u32 40, %s974_s10  ;;  %v1019_v0 = vmov 1   ;;  %v1020_v1 = vmov 0   ;;  %v1179_v39 = vld [vmem:[%s1648_s1] sm:$0xff] }
   0xc   : > { %996 = vset.pattern.permute.xlu2 %v1019_v0  ;;  %995 = vset.pattern.permute.xlu1 %v1020_v1  ;;  %v1186_v41 = vperm.slane %v1179_v39, 1  ;;  %v209_v42 = vperm.slane %v1179_v39, 0  ;;  %v1201_v49 = vperm.slane %v1179_v39, 2 }
   0xd   : > { %994 = vset.pattern.permute.xlu0 %v1020_v1  ;;  %p136_p3 = scmp.lt.s32.totalorder %s135_s11, 79 }
   0xf   : > { %s1666_s11 = smov (!%p136_p3, %s135_s11), 79 }
  0x10   : > { %s979_s12 = sshll.u32 %s1666_s11, 3 }
  0x11   : > { %s1054_s15 = scalar_lea.vmem %s1647_s0, %s979_s12  ;;  %s1212_s20 = scalar_lea.vmem %s1649_s2, %s979_s12 }
  0x12   : > { %v1057_v2 = vld [vmem:[%s1054_s15 + $0x10] sm:$0xff]  ;;  %v147_v3 = vld [vmem:[%s1054_s15] sm:$0xff]  ;;  %v150_v4 = vld [vmem:[%s1054_s15 + $0x18] sm:$0xff] }
  0x13   : > { %201 = vperm.xlu1 %995, %v1057_v2   ;;  %215 = vperm.xlu2 %996, %v147_v3   ;;  %v148_v5 = vld [vmem:[%s1054_s15 + $0x8] sm:$0xff]  ;;  %v154_v6 = vld [vmem:[%s1054_s15 + $0x38] sm:$0xff]  ;;  %v151_v7 = vld [vmem:[%s1054_s15 + $0x20] sm:$0xff] }
  0x14   : > { %191 = vperm.xlu0 %994, %v147_v3   ;;  %v1067_v8 = vld [vmem:[%s1054_s15 + $0x40] sm:$0xff]  ;;  %v153_v9 = vld [vmem:[%s1054_s15 + $0x30] sm:$0xff]  ;;  %v152_v10 = vld [vmem:[%s1054_s15 + $0x28] sm:$0xff] }
  0x15   : > { %v1073_v11 = vld [vmem:[%s1054_s15 + $0x58] sm:$0xff]  ;;  %v1079_v12 = vld [vmem:[%s1054_s15 + $0x70] sm:$0xff]  ;;  %v1083_v13 = vld [vmem:[%s1054_s15 + $0x88] sm:$0xff] }
  0x16   : > { %v1087_v14 = vld [vmem:[%s1054_s15 + $0x50] sm:$0xff]  ;;  %v1090_v15 = vld [vmem:[%s1054_s15 + $0x48] sm:$0xff]  ;;  %v1095_v16 = vld [vmem:[%s1054_s15 + $0xa0] sm:$0xff] }
  0x17   : > { %v1099_v17 = vld [vmem:[%s1054_s15 + $0x68] sm:$0xff]  ;;  %v1102_v18 = vld [vmem:[%s1054_s15 + $0x60] sm:$0xff]  ;;  %v1107_v19 = vld [vmem:[%s1054_s15 + $0xb8] sm:$0xff] }
  0x18   : > { %v1111_v20 = vld [vmem:[%s1054_s15 + $0x80] sm:$0xff]  ;;  %v1114_v21 = vld [vmem:[%s1054_s15 + $0x78] sm:$0xff]  ;;  %v1119_v22 = vld [vmem:[%s1054_s15 + $0xd0] sm:$0xff] }
  0x19   : > { %v1123_v23 = vld [vmem:[%s1054_s15 + $0x98] sm:$0xff]  ;;  %v1126_v24 = vld [vmem:[%s1054_s15 + $0x90] sm:$0xff]  ;;  %v1131_v25 = vld [vmem:[%s1054_s15 + $0xe8] sm:$0xff] }
  0x1a   : > { %v1135_v26 = vld [vmem:[%s1054_s15 + $0xb0] sm:$0xff]  ;;  %v1138_v27 = vld [vmem:[%s1054_s15 + $0xa8] sm:$0xff]  ;;  %v1143_v28 = vld [vmem:[%s1054_s15 + $0x100] sm:$0xff] }
  0x1b   : > { %206 = vperm.xlu1 %995, %v150_v4   ;;  %219 = vperm.xlu2 %996, %v148_v5   ;;  %v1147_v29 = vld [vmem:[%s1054_s15 + $0xc8] sm:$0xff]  ;;  %v1150_v30 = vld [vmem:[%s1054_s15 + $0xc0] sm:$0xff]  ;;  %v1155_v32 = vld [vmem:[%s1054_s15 + $0x118] sm:$0xff] }
  0x1c   : > { %196 = vperm.xlu0 %994, %v148_v5   ;;  %v1159_v33 = vld [vmem:[%s1054_s15 + $0xe0] sm:$0xff]  ;;  %v1162_v34 = vld [vmem:[%s1054_s15 + $0xd8] sm:$0xff]  ;;  %v1167_v36 = vld [vmem:[%s1054_s15 + $0x130] sm:$0xff]  ;;  %v289_v5 = vperm.slane %v1179_v39, 4 }
  0x1d   : > { %v1171_v37 = vld [vmem:[%s1054_s15 + $0xf8] sm:$0xff]  ;;  %v1174_v38 = vld [vmem:[%s1054_s15 + $0xf0] sm:$0xff]  ;;  %v1194_v44 = vld [vmem:[%s1054_s15 + $0x108] sm:$0xff] }
  0x1e   : > { %v1191_v43 = vld [vmem:[%s1054_s15 + $0x110] sm:$0xff]  ;;  %v1216_v54 = vld [vmem:[%s1054_s15 + $0x128] sm:$0xff]  ;;  %v1219_v55 = vld [vmem:[%s1054_s15 + $0x120] sm:$0xff] }
  0x1f   : > { %1651 = vst [vmem:[#allocation2_spill] sm:$0xff] %v1219_v55  ;;  %v1228_v63 = vld [vmem:[%s1054_s15 + $0x138] sm:$0xff] }
  0x23   : > { %997 = vset.pattern.permute.xlu1 %v1019_v0  ;;  %998 = vset.pattern.permute.xlu2 %v1020_v1 }
  0x24   : > { %265 = vperm.xlu0 %994, %v154_v6   ;;  %227 = vperm.xlu1 %997, %v150_v4  }
  0x25   : > { %250 = vperm.xlu2 %998, %v151_v7  }
  0x2c   : > { %309 = vperm.xlu0 %994, %v1067_v8   ;;  %999 = vset.pattern.permute.xlu1 %v1020_v1 }
  0x2d   : > { %260 = vperm.xlu2 %998, %v153_v9   ;;  %255 = vperm.xlu1 %999, %v152_v10  }
  0x34   : > { %324 = vperm.xlu0 %994, %v1073_v11  }
  0x35   : > { %1001 = vset.pattern.permute.xlu2 %v1019_v0  ;;  %1000 = vset.pattern.permute.xlu1 %v1019_v0 }
  0x36   : > { %278 = vperm.xlu2 %1001, %v152_v10   ;;  %274 = vperm.xlu1 %1000, %v151_v7  }
  0x3c   : > { %339 = vperm.xlu0 %994, %v1079_v12  }
  0x3e   : > { %286 = vperm.xlu2 %1001, %v154_v6   ;;  %282 = vperm.xlu1 %1000, %v153_v9  }
  0x44   : > { %354 = vperm.xlu0 %994, %v1083_v13  }
  0x46   : > { %1003 = vset.pattern.permute.xlu2 %v1020_v1  ;;  %1002 = vset.pattern.permute.xlu1 %v1020_v1  ;;  %v268_v1 = vperm.slane %v1179_v39, 3 }
  0x47   : > { %319 = vperm.xlu2 %1003, %v1087_v14   ;;  %314 = vperm.xlu1 %1002, %v1090_v15  }
  0x4c   : > { %369 = vperm.xlu0 %994, %v1095_v16  }
  0x4f   : > { %334 = vperm.xlu2 %1003, %v1099_v17   ;;  %329 = vperm.xlu1 %1002, %v1102_v18  }
  0x54   : > { %384 = vperm.xlu0 %994, %v1107_v19  }
  0x57   : > { %349 = vperm.xlu2 %1003, %v1111_v20   ;;  %344 = vperm.xlu1 %1002, %v1114_v21  }
  0x5c   : > { %399 = vperm.xlu0 %994, %v1119_v22  }
  0x5f   : > { %364 = vperm.xlu2 %1003, %v1123_v23   ;;  %359 = vperm.xlu1 %1002, %v1126_v24  }
  0x64   : > { %414 = vperm.xlu0 %994, %v1131_v25  }
  0x67   : > { %379 = vperm.xlu2 %1003, %v1135_v26   ;;  %374 = vperm.xlu1 %1002, %v1138_v27  }
  0x6c   : > { %429 = vperm.xlu0 %994, %v1143_v28  }
  0x6d   : > { %v216_v31 = vpop.permute.xlu2 %215 }
  0x6e   : > { %v231_v45 = vmul.f32 %v1186_v41, %v216_v31 }
  0x6f   : > { %394 = vperm.xlu2 %1003, %v1147_v29   ;;  %389 = vperm.xlu1 %1002, %v1150_v30  }
  0x74   : > { %444 = vperm.xlu0 %994, %v1155_v32  }
  0x75   : > { %v220_v35 = vpop.permute.xlu2 %219 }
  0x76   : > { %v232_v56 = vmul.f32 %v1186_v41, %v220_v35 }
  0x77   : > { %409 = vperm.xlu2 %1003, %v1159_v33   ;;  %404 = vperm.xlu1 %1002, %v1162_v34  }
  0x7c   : > { %459 = vperm.xlu0 %994, %v1167_v36  }
  0x7f   : > { %424 = vperm.xlu2 %1003, %v1171_v37   ;;  %419 = vperm.xlu1 %1002, %v1174_v38   ;;  %v1183_v40 = vpop.permute.xlu2 %250 }
  0x84   : > { %1004 = vset.pattern.permute.xlu0 %v1019_v0 }
  0x85   : > { %223 = vperm.xlu0 %1004, %v1057_v2   ;;  %v202_v46 = vpop.permute.xlu1 %201 }
  0x86   : > { %v1198_v47 = vmul.f32 %v209_v42, %v202_v46  ;;  %v192_v48 = vpop.permute.xlu0 %191 }
  0x87   : > { %v210_v50 = vmul.f32 %v209_v42, %v192_v48  ;;  %439 = vperm.xlu2 %1003, %v1191_v43   ;;  %434 = vperm.xlu1 %1002, %v1194_v44   ;;  %v1205_v51 = vpop.permute.xlu2 %260 }
  0x89   : > { %v235_v52 = vadd.f32 %v231_v45, %v210_v50  ;;  %v298_v45 = vperm.slane %v1179_v39, 5 }
  0x8b   : > { %v240_v53 = vadd.f32 %v1201_v49, %v235_v52 }
  0x8d   : > { %244 = vst [vmem:[%s1212_s20] sm:$0xff] %v240_v53  ;;  %505 = vperm.xlu0 %1004, %v1090_v15   ;;  %v207_v57 = vpop.permute.xlu1 %206 }
  0x8e   : > { %v197_v58 = vpop.permute.xlu0 %196  ;;  %v213_v4 = vmul.f32 %v209_v42, %v207_v57 }
  0x8f   : > { %v211_v59 = vmul.f32 %v209_v42, %v197_v58  ;;  %454 = vperm.xlu2 %1003, %v1216_v54   ;;  %449 = vperm.xlu1 %1002, %v1219_v55  }
  0x90   : > { %v279_v60 = vpop.permute.xlu2 %278 }
  0x91   : > { %v236_v61 = vadd.f32 %v232_v56, %v211_v59  ;;  %v291_v48 = vmul.f32 %v289_v5, %v279_v60  ;;  %v269_v60 = vmul.f32 %v268_v1, %v1183_v40 }
  0x93   : > { %v241_v62 = vadd.f32 %v1201_v49, %v236_v61 }
  0x95   : > { %245 = vst [vmem:[%s1212_s20 + $0x8] sm:$0xff] %v241_v62  ;;  %525 = vperm.xlu0 %1004, %v1079_v12  }
  0x96   : > { %v266_v2 = vpop.permute.xlu0 %265  ;;  %v228_v3 = vpop.permute.xlu1 %227 }
  0x97   : > { %v272_v6 = vmul.f32 %v268_v1, %v266_v2  ;;  %v234_v7 = vmul.f32 %v1186_v41, %v228_v3  ;;  %1005 = vset.pattern.permute.xlu2 %v1019_v0  ;;  %464 = vperm.xlu1 %1002, %v1228_v63  }
  0x98   : > { %501 = vperm.xlu2 %1005, %v1067_v8   ;;  %v287_v9 = vpop.permute.xlu2 %286 }
  0x99   : > { %v238_v10 = vadd.f32 %v234_v7, %v213_v4  ;;  %v293_v31 = vmul.f32 %v289_v5, %v287_v9  ;;  %v271_v7 = vmul.f32 %v268_v1, %v1205_v51 }
  0x9b   : > { %v243_v35 = vadd.f32 %v1201_v49, %v238_v10  ;;  %v297_v42 = vadd.f32 %v293_v31, %v272_v6 }
  0x9d   : > { %247 = vst [vmem:[%s1212_s20 + $0x18] sm:$0xff] %v243_v35  ;;  %v302_v46 = vadd.f32 %v298_v45, %v297_v42  ;;  %537 = vperm.xlu0 %1004, %v1083_v13  }
  0x9e   : > { %v1242_v50 = vpop.permute.xlu0 %309 }
  0x9f   : > { %306 = vst [vmem:[%s1212_s20 + $0x38] sm:$0xff] %v302_v46  ;;  %1006 = vset.pattern.permute.xlu1 %v1019_v0  ;;  %v256_v52 = vpop.permute.xlu1 %255 }
  0xa0   : > { %v270_v53 = vmul.f32 %v268_v1, %v256_v52  ;;  %513 = vperm.xlu2 %1005, %v1073_v11   ;;  %509 = vperm.xlu1 %1006, %v1087_v14  }
  0xa1   : > { %v1248_v56 = vpop.permute.xlu2 %319 }
  0xa2   : > { %v295_v57 = vadd.f32 %v291_v48, %v270_v53 }
  0xa4   : > { %v300_v58 = vadd.f32 %v298_v45, %v295_v57 }
  0xa5   : > { %549 = vperm.xlu0 %1004, %v1095_v16  }
  0xa6   : > { %304 = vst [vmem:[%s1212_s20 + $0x28] sm:$0xff] %v300_v58  ;;  %v1252_v59 = vpop.permute.xlu0 %324 }
  0xa8   : > { %521 = vperm.xlu2 %1005, %v1099_v17   ;;  %517 = vperm.xlu1 %1006, %v1102_v18   ;;  %v275_v0 = vpop.permute.xlu1 %274 }
  0xa9   : > { %v290_v61 = vmul.f32 %v289_v5, %v275_v0  ;;  %v1257_v62 = vpop.permute.xlu2 %334 }
  0xab   : > { %v294_v2 = vadd.f32 %v290_v61, %v269_v60 }
  0xad   : > { %v299_v3 = vadd.f32 %v298_v45, %v294_v2  ;;  %561 = vperm.xlu0 %1004, %v1107_v19   ;;  %v1021_v2 = vmov 2  }
  0xae   : > { %v1260_v4 = vpop.permute.xlu0 %339 }
  0xaf   : > { %303 = vst [vmem:[%s1212_s20 + $0x20] sm:$0xff] %v299_v3 }
  0xb0   : > { %533 = vperm.xlu2 %1005, %v1111_v20   ;;  %529 = vperm.xlu1 %1006, %v1114_v21   ;;  %v283_v6 = vpop.permute.xlu1 %282 }
  0xb1   : > { %v292_v9 = vmul.f32 %v289_v5, %v283_v6  ;;  %v1266_v40 = vpop.permute.xlu2 %349 }
  0xb3   : > { %v296_v10 = vadd.f32 %v292_v9, %v271_v7 }
  0xb5   : > { %v301_v31 = vadd.f32 %v298_v45, %v296_v10  ;;  %573 = vperm.xlu0 %1004, %v1119_v22  }
  0xb6   : > { %v1269_v35 = vpop.permute.xlu0 %354 }
  0xb7   : > { %305 = vst [vmem:[%s1212_s20 + $0x30] sm:$0xff] %v301_v31 }
  0xb8   : > { %545 = vperm.xlu2 %1005, %v1123_v23   ;;  %541 = vperm.xlu1 %1006, %v1126_v24  }
  0xb9   : > { %v1274_v42 = vpop.permute.xlu2 %364  ;;  %v1276_v46 = vpop.permute.xlu1 %314 }
  0xbd   : > { %585 = vperm.xlu0 %1004, %v1131_v25  }
  0xbe   : > { %v1279_v51 = vpop.permute.xlu0 %369 }
  0xc0   : > { %557 = vperm.xlu2 %1005, %v1135_v26   ;;  %553 = vperm.xlu1 %1006, %v1138_v27  }
  0xc1   : > { %v1283_v1 = vpop.permute.xlu2 %379  ;;  %v1285_v5 = vpop.permute.xlu1 %329 }
  0xc5   : > { %597 = vperm.xlu0 %1004, %v1143_v28  }
  0xc6   : > { %v1288_v45 = vpop.permute.xlu0 %384 }
  0xc8   : > { %569 = vperm.xlu2 %1005, %v1147_v29   ;;  %565 = vperm.xlu1 %1006, %v1150_v30  }
  0xc9   : > { %v1292_v48 = vpop.permute.xlu2 %394  ;;  %v1294_v52 = vpop.permute.xlu1 %344 }
  0xcd   : > { %609 = vperm.xlu0 %1004, %v1155_v32  }
  0xce   : > { %v1297_v53 = vpop.permute.xlu0 %399 }
  0xd0   : > { %581 = vperm.xlu2 %1005, %v1159_v33   ;;  %577 = vperm.xlu1 %1006, %v1162_v34  }
  0xd1   : > { %v1301_v57 = vpop.permute.xlu2 %409  ;;  %v1303_v58 = vpop.permute.xlu1 %359 }
  0xd5   : > { %621 = vperm.xlu0 %1004, %v1167_v36  }
  0xd6   : > { %v1306_v0 = vpop.permute.xlu0 %414 }
  0xd8   : > { %593 = vperm.xlu2 %1005, %v1171_v37   ;;  %589 = vperm.xlu1 %1006, %v1174_v38  }
  0xd9   : > { %v1310_v60 = vpop.permute.xlu2 %424  ;;  %v1312_v61 = vpop.permute.xlu1 %374 }
  0xdd   : > { %1008 = vset.pattern.permute.xlu0 %v1021_v2 }
  0xde   : > { %698 = vperm.xlu0 %1008, %v1090_v15   ;;  %v1315_v3 = vpop.permute.xlu0 %429 }
  0xe0   : > { %605 = vperm.xlu2 %1005, %v1191_v43   ;;  %601 = vperm.xlu1 %1006, %v1194_v44  }
  0xe1   : > { %v1319_v6 = vpop.permute.xlu2 %439  ;;  %v1321_v7 = vpop.permute.xlu1 %389 }
  0xe2   : > { %1652 = vst [vmem:[#allocation3_spill] sm:$0xff] %v1319_v6  ;;  %v1336_v6 = vperm.slane %v1179_v39, 6 }
  0xe3   : > { %1653 = vst [vmem:[#allocation4_spill] sm:$0xff] %v1321_v7  ;;  %v1339_v7 = vperm.slane %v1179_v39, 7 }
  0xe6   : > { %718 = vperm.xlu0 %1008, %v1079_v12   ;;  %v1324_v9 = vpop.permute.xlu0 %444 }
  0xe8   : > { %617 = vperm.xlu2 %1005, %v1216_v54   ;;  %613 = vperm.xlu1 %1006, %v1219_v55  }
  0xe9   : > { %v1328_v10 = vpop.permute.xlu2 %454  ;;  %v1330_v15 = vpop.permute.xlu1 %404 }
  0xea   : > { %1654 = vst [vmem:[#allocation5_spill] sm:$0xff] %v1328_v10 }
  0xeb   : > { %1655 = vst [vmem:[#allocation6_spill] sm:$0xff] %v1330_v15  ;;  %v468_v15 = vmul.f32 %v1336_v6, %v1242_v50 }
  0xee   : > { %730 = vperm.xlu0 %1008, %v1083_v13   ;;  %v1333_v31 = vpop.permute.xlu0 %459 }
  0xef   : > { %1656 = vst [vmem:[#allocation7_spill] sm:$0xff] %v1333_v31 }
  0xf0   : > { %1007 = vset.pattern.permute.xlu2 %v1021_v2  ;;  %625 = vperm.xlu1 %1006, %v1228_v63  }
  0xf1   : > { %694 = vperm.xlu2 %1007, %v1067_v8   ;;  %v1343_v12 = vpop.permute.xlu1 %419 }
  0xf2   : > { %1657 = vst [vmem:[#allocation8_spill] sm:$0xff] %v1343_v12  ;;  %v502_v10 = vpop.permute.xlu2 %501 }
  0xf3   : > { %v629_v13 = vmul.f32 %v1339_v7, %v502_v10  ;;  %v471_v10 = vmul.f32 %v1336_v6, %v1252_v59  ;;  %v473_v59 = vmul.f32 %v1336_v6, %v1257_v62 }
  0xf5   : > { %v1348_v31 = vadd.f32 %v629_v13, %v468_v15 }
  0xf6   : > { %742 = vperm.xlu0 %1008, %v1095_v16  }
  0xf7   : > { %v224_v39 = vpop.permute.xlu0 %223 }
  0xf8   : > { %v233_v55 = vmul.f32 %v1186_v41, %v224_v39  ;;  %1009 = vset.pattern.permute.xlu1 %v1021_v2 }
  0xf9   : > { %706 = vperm.xlu2 %1007, %v1073_v11   ;;  %702 = vperm.xlu1 %1009, %v1087_v14   ;;  %v1354_v8 = vpop.permute.xlu1 %434  ;;  %v469_v14 = vmul.f32 %v1336_v6, %v1276_v46 }
  0xfa   : > { %v237_v12 = vadd.f32 %v233_v55, %v1198_v47  ;;  %v514_v50 = vpop.permute.xlu2 %513 }
  0xfb   : > { %v632_v15 = vmul.f32 %v1339_v7, %v514_v50  ;;  %v476_v50 = vmul.f32 %v1336_v6, %v1266_v40 }
  0xfc   : > { %v242_v16 = vadd.f32 %v1201_v49, %v237_v12 }
  0xfd   : > { %v1361_v13 = vadd.f32 %v632_v15, %v471_v10 }
  0xfe   : > { %246 = vst [vmem:[%s1212_s20 + $0x10] sm:$0xff] %v242_v16  ;;  %754 = vperm.xlu0 %1008, %v1107_v19  }
  0xff   : > { %v506_v11 = vpop.permute.xlu0 %505 }
 0x100   : > { %v630_v41 = vmul.f32 %v1339_v7, %v506_v11  ;;  %v470_v11 = vmul.f32 %v1336_v6, %v1248_v56 }
 0x101   : > { %714 = vperm.xlu2 %1007, %v1099_v17   ;;  %710 = vperm.xlu1 %1009, %v1102_v18   ;;  %v1370_v47 = vpop.permute.xlu1 %449  ;;  %v474_v17 = vmul.f32 %v1336_v6, %v1260_v4 }
 0x102   : > { %v1372_v55 = vadd.f32 %v630_v41, %v469_v14  ;;  %v522_v49 = vpop.permute.xlu2 %521 }
 0x103   : > { %v634_v19 = vmul.f32 %v1339_v7, %v522_v49 }
 0x105   : > { %v1377_v2 = vadd.f32 %v634_v19, %v473_v59 }
 0x106   : > { %766 = vperm.xlu0 %1008, %v1119_v22  }
 0x107   : > { %v526_v46 = vpop.permute.xlu0 %525 }
 0x108   : > { %v635_v18 = vmul.f32 %v1339_v7, %v526_v46  ;;  %v482_v46 = vmul.f32 %v1336_v6, %v1283_v1 }
 0x109   : > { %726 = vperm.xlu2 %1007, %v1111_v20   ;;  %722 = vperm.xlu1 %1009, %v1114_v21   ;;  %v1385_v12 = vpop.permute.xlu1 %464  ;;  %v477_v20 = vmul.f32 %v1336_v6, %v1269_v35 }
 0x10a   : > { %v1387_v39 = vadd.f32 %v635_v18, %v474_v17  ;;  %v534_v62 = vpop.permute.xlu2 %533 }
 0x10b   : > { %v637_v22 = vmul.f32 %v1339_v7, %v534_v62 }
 0x10d   : > { %v1392_v10 = vadd.f32 %v637_v22, %v476_v50 }
 0x10e   : > { %778 = vperm.xlu0 %1008, %v1131_v25   ;;  %v479_v25 = vmul.f32 %v1336_v6, %v1274_v42 }
 0x10f   : > { %v538_v4 = vpop.permute.xlu0 %537 }
 0x110   : > { %v638_v21 = vmul.f32 %v1339_v7, %v538_v4  ;;  %v485_v4 = vmul.f32 %v1336_v6, %v1292_v48 }
 0x111   : > { %738 = vperm.xlu2 %1007, %v1123_v23   ;;  %734 = vperm.xlu1 %1009, %v1126_v24   ;;  %v480_v24 = vmul.f32 %v1336_v6, %v1279_v51 }
 0x112   : > { %v1400_v15 = vadd.f32 %v638_v21, %v477_v20  ;;  %v546_v16 = vpop.permute.xlu2 %545  ;;  %v510_v40 = vpop.permute.xlu1 %509 }
 0x113   : > { %v640_v14 = vmul.f32 %v1339_v7, %v546_v16  ;;  %v631_v35 = vmul.f32 %v1339_v7, %v510_v40 }
 0x115   : > { %v1408_v41 = vadd.f32 %v640_v14, %v479_v25  ;;  %v1410_v49 = vadd.f32 %v631_v35, %v470_v11  ;;  %v488_v25 = vmul.f32 %v1336_v6, %v1301_v57 }
 0x116   : > { %790 = vperm.xlu0 %1008, %v1143_v28   ;;  %v472_v28 = vmul.f32 %v1336_v6, %v1285_v5 }
 0x117   : > { %v550_v23 = vpop.permute.xlu0 %549 }
 0x118   : > { %v641_v59 = vmul.f32 %v1339_v7, %v550_v23 }
 0x119   : > { %750 = vperm.xlu2 %1007, %v1135_v26   ;;  %746 = vperm.xlu1 %1009, %v1138_v27   ;;  %v483_v27 = vmul.f32 %v1336_v6, %v1288_v45 }
 0x11a   : > { %v1418_v56 = vadd.f32 %v641_v59, %v480_v24  ;;  %v558_v42 = vpop.permute.xlu2 %557  ;;  %v518_v19 = vpop.permute.xlu1 %517 }
 0x11b   : > { %v643_v17 = vmul.f32 %v1339_v7, %v558_v42  ;;  %v633_v51 = vmul.f32 %v1339_v7, %v518_v19  ;;  %v491_v42 = vmul.f32 %v1336_v6, %v1310_v60  ;;  %v481_v19 = vmul.f32 %v1336_v6, %v1312_v61 }
 0x11d   : > { %v1426_v18 = vadd.f32 %v643_v17, %v482_v46  ;;  %v1428_v62 = vadd.f32 %v633_v51, %v472_v28 }
 0x11e   : > { %802 = vperm.xlu0 %1008, %v1155_v32   ;;  %v475_v32 = vmul.f32 %v1336_v6, %v1294_v52 }
 0x11f   : > { %v562_v26 = vpop.permute.xlu0 %561 }
 0x120   : > { %v644_v50 = vmul.f32 %v1339_v7, %v562_v26 }
 0x121   : > { %762 = vperm.xlu2 %1007, %v1147_v29   ;;  %758 = vperm.xlu1 %1009, %v1150_v30   ;;  %v486_v30 = vmul.f32 %v1336_v6, %v1297_v53 }
 0x122   : > { %v1436_v1 = vadd.f32 %v644_v50, %v483_v27  ;;  %v570_v5 = vpop.permute.xlu2 %569  ;;  %v530_v22 = vpop.permute.xlu1 %529  ;;  %v1658_v27 = vld [vmem:[#allocation3_spill] sm:$0xff] }
 0x123   : > { %v646_v20 = vmul.f32 %v1339_v7, %v570_v5  ;;  %v636_v45 = vmul.f32 %v1339_v7, %v530_v22  ;;  %v494_v50 = vmul.f32 %v1336_v6, %v1658_v27  ;;  %v1659_v5 = vld [vmem:[#allocation4_spill] sm:$0xff] }
 0x124   : > { %v484_v22 = vmul.f32 %v1336_v6, %v1659_v5 }
 0x125   : > { %v1444_v21 = vadd.f32 %v646_v20, %v485_v4  ;;  %v1446_v16 = vadd.f32 %v636_v45, %v475_v32 }
 0x126   : > { %814 = vperm.xlu0 %1008, %v1167_v36   ;;  %v478_v36 = vmul.f32 %v1336_v6, %v1303_v58 }
 0x127   : > { %v574_v29 = vpop.permute.xlu0 %573 }
 0x128   : > { %v647_v40 = vmul.f32 %v1339_v7, %v574_v29  ;;  %v1660_v29 = vld [vmem:[#allocation2_spill] sm:$0xff] }
 0x129   : > { %774 = vperm.xlu2 %1007, %v1159_v33   ;;  %770 = vperm.xlu1 %1009, %v1162_v34   ;;  %v489_v34 = vmul.f32 %v1336_v6, %v1306_v0 }
 0x12a   : > { %v1454_v48 = vadd.f32 %v647_v40, %v486_v30  ;;  %v582_v52 = vpop.permute.xlu2 %581  ;;  %v542_v11 = vpop.permute.xlu1 %541 }
 0x12b   : > { %v649_v14 = vmul.f32 %v1339_v7, %v582_v52  ;;  %v639_v53 = vmul.f32 %v1339_v7, %v542_v11  ;;  %v1661_v11 = vld [vmem:[#allocation5_spill] sm:$0xff] }
 0x12d   : > { %v1462_v35 = vadd.f32 %v649_v14, %v488_v25  ;;  %v1464_v23 = vadd.f32 %v639_v53, %v478_v36  ;;  %v497_v25 = vmul.f32 %v1336_v6, %v1661_v11  ;;  %v1662_v36 = vld [vmem:[#allocation6_spill] sm:$0xff] }
 0x12e   : > { %v487_v14 = vmul.f32 %v1336_v6, %v1662_v36 }
 0x12f   : > { %v586_v33 = vpop.permute.xlu0 %585 }
 0x130   : > { %v650_v24 = vmul.f32 %v1339_v7, %v586_v33 }
 0x131   : > { %786 = vperm.xlu2 %1007, %v1171_v37   ;;  %782 = vperm.xlu1 %1009, %v1174_v38   ;;  %v492_v38 = vmul.f32 %v1336_v6, %v1315_v3 }
 0x132   : > { %v1471_v57 = vadd.f32 %v650_v24, %v489_v34  ;;  %v594_v58 = vpop.permute.xlu2 %593  ;;  %v554_v59 = vpop.permute.xlu1 %553  ;;  %v1663_v24 = vld [vmem:[#allocation7_spill] sm:$0xff] }
 0x133   : > { %v652_v46 = vmul.f32 %v1339_v7, %v594_v58  ;;  %v642_v0 = vmul.f32 %v1339_v7, %v554_v59  ;;  %v498_v58 = vmul.f32 %v1336_v6, %v1663_v24 }
 0x135   : > { %v1479_v28 = vadd.f32 %v652_v46, %v491_v42  ;;  %v1481_v17 = vadd.f32 %v642_v0, %v481_v19  ;;  %v1523_v42 = vld [vmem:[%s1648_s1 + $0x8] ss:$0 sm:$0xff]  ;;  %v1664_v0 = vld [vmem:[#allocation8_spill] sm:$0xff] }
 0x137   : > { %v598_v37 = vpop.permute.xlu0 %597 }
 0x138   : > { %v653_v51 = vmul.f32 %v1339_v7, %v598_v37  ;;  %v490_v37 = vmul.f32 %v1336_v6, %v1664_v0 }
 0x139   : > { %798 = vperm.xlu2 %1007, %v1191_v43   ;;  %794 = vperm.xlu1 %1009, %v1194_v44   ;;  %v495_v44 = vmul.f32 %v1336_v6, %v1324_v9 }
 0x13a   : > { %v1488_v60 = vadd.f32 %v653_v51, %v492_v38  ;;  %v606_v61 = vpop.permute.xlu2 %605  ;;  %v566_v26 = vpop.permute.xlu1 %565 }
 0x13b   : > { %v655_v4 = vmul.f32 %v1339_v7, %v606_v61  ;;  %v645_v3 = vmul.f32 %v1339_v7, %v566_v26 }
 0x13d   : > { %v1496_v32 = vadd.f32 %v655_v4, %v494_v50  ;;  %v1498_v20 = vadd.f32 %v645_v3, %v484_v22  ;;  %v493_v22 = vmul.f32 %v1336_v6, %v1354_v8  ;;  %v496_v8 = vmul.f32 %v1336_v6, %v1370_v47 }
 0x13e   : > { %v499_v47 = vmul.f32 %v1336_v6, %v1385_v12 }
 0x13f   : > { %v610_v43 = vpop.permute.xlu0 %609 }
 0x140   : > { %v656_v45 = vmul.f32 %v1339_v7, %v610_v43 }
 0x141   : > { %810 = vperm.xlu2 %1007, %v1216_v54   ;;  %806 = vperm.xlu1 %1009, %v1660_v29  }
 0x142   : > { %v1505_v30 = vadd.f32 %v656_v45, %v495_v44  ;;  %v618_v40 = vpop.permute.xlu2 %617  ;;  %v578_v52 = vpop.permute.xlu1 %577 }
 0x143   : > { %v658_v53 = vmul.f32 %v1339_v7, %v618_v40  ;;  %v648_v9 = vmul.f32 %v1339_v7, %v578_v52 }
 0x145   : > { %v1513_v33 = vadd.f32 %v658_v53, %v497_v25  ;;  %v1515_v54 = vadd.f32 %v648_v9, %v487_v14 }
 0x147   : > { %v622_v34 = vpop.permute.xlu0 %621 }
 0x148   : > { %v659_v59 = vmul.f32 %v1339_v7, %v622_v34 }
 0x149   : > { %818 = vperm.xlu1 %1009, %v1228_v63  }
 0x14a   : > { %v1526_v19 = vadd.f32 %v659_v59, %v498_v58  ;;  %v590_v46 = vpop.permute.xlu1 %589 }
 0x14b   : > { %v651_v38 = vmul.f32 %v1339_v7, %v590_v46  ;;  %v695_v51 = vpop.permute.xlu2 %694 }
 0x14c   : > { %v822_v61 = vmul.f32 %v1523_v42, %v695_v51 }
 0x14d   : > { %v1532_v26 = vadd.f32 %v651_v38, %v490_v37 }
 0x14e   : > { %v854_v27 = vadd.f32 %v822_v61, %v1348_v31 }
 0x150   : > { %886 = vst [vmem:[%s1212_s20 + $0x40] sm:$0xff] %v854_v27  ;;  %v699_v50 = vpop.permute.xlu0 %698 }
 0x151   : > { %v823_v63 = vmul.f32 %v1523_v42, %v699_v50 }
 0x152   : > { %v602_v5 = vpop.permute.xlu1 %601 }
 0x153   : > { %v855_v4 = vadd.f32 %v823_v63, %v1372_v55  ;;  %v654_v3 = vmul.f32 %v1339_v7, %v602_v5  ;;  %v707_v43 = vpop.permute.xlu2 %706 }
 0x154   : > { %v825_v44 = vmul.f32 %v1523_v42, %v707_v43 }
 0x155   : > { %887 = vst [vmem:[%s1212_s20 + $0x48] sm:$0xff] %v855_v4  ;;  %v1543_v45 = vadd.f32 %v654_v3, %v493_v22 }
 0x156   : > { %v857_v31 = vadd.f32 %v825_v44, %v1361_v13 }
 0x158   : > { %889 = vst [vmem:[%s1212_s20 + $0x58] sm:$0xff] %v857_v31  ;;  %v719_v29 = vpop.permute.xlu0 %718 }
 0x159   : > { %v828_v40 = vmul.f32 %v1523_v42, %v719_v29 }
 0x15a   : > { %v614_v52 = vpop.permute.xlu1 %613 }
 0x15b   : > { %v860_v55 = vadd.f32 %v828_v40, %v1387_v39  ;;  %v657_v11 = vmul.f32 %v1339_v7, %v614_v52  ;;  %v715_v25 = vpop.permute.xlu2 %714 }
 0x15c   : > { %v827_v36 = vmul.f32 %v1523_v42, %v715_v25 }
 0x15d   : > { %892 = vst [vmem:[%s1212_s20 + $0x70] sm:$0xff] %v860_v55  ;;  %v1554_v14 = vadd.f32 %v657_v11, %v496_v8 }
 0x15e   : > { %v859_v13 = vadd.f32 %v827_v36, %v1377_v2 }
 0x160   : > { %891 = vst [vmem:[%s1212_s20 + $0x68] sm:$0xff] %v859_v13  ;;  %v731_v53 = vpop.permute.xlu0 %730 }
 0x161   : > { %v831_v9 = vmul.f32 %v1523_v42, %v731_v53 }
 0x162   : > { %v626_v34 = vpop.permute.xlu1 %625 }
 0x163   : > { %v863_v39 = vadd.f32 %v831_v9, %v1400_v15  ;;  %v660_v24 = vmul.f32 %v1339_v7, %v626_v34  ;;  %v727_v58 = vpop.permute.xlu2 %726 }
 0x164   : > { %v830_v59 = vmul.f32 %v1523_v42, %v727_v58 }
 0x165   : > { %895 = vst [vmem:[%s1212_s20 + $0x88] sm:$0xff] %v863_v39  ;;  %v1565_v2 = vadd.f32 %v660_v24, %v499_v47 }
 0x166   : > { %v862_v46 = vadd.f32 %v830_v59, %v1392_v10 }
 0x168   : > { %894 = vst [vmem:[%s1212_s20 + $0x80] sm:$0xff] %v862_v46  ;;  %v743_v0 = vpop.permute.xlu0 %742 }
 0x169   : > { %v834_v37 = vmul.f32 %v1523_v42, %v743_v0 }
 0x16b   : > { %v866_v6 = vadd.f32 %v834_v37, %v1418_v56  ;;  %v739_v12 = vpop.permute.xlu2 %738  ;;  %v703_v15 = vpop.permute.xlu1 %702 }
 0x16c   : > { %v833_v7 = vmul.f32 %v1523_v42, %v739_v12  ;;  %v824_v38 = vmul.f32 %v1523_v42, %v703_v15 }
 0x16d   : > { %898 = vst [vmem:[%s1212_s20 + $0xa0] sm:$0xff] %v866_v6 }
 0x16e   : > { %v865_v51 = vadd.f32 %v833_v7, %v1408_v41  ;;  %v856_v10 = vadd.f32 %v824_v38, %v1410_v49 }
 0x170   : > { %897 = vst [vmem:[%s1212_s20 + $0x98] sm:$0xff] %v865_v51  ;;  %v755_v61 = vpop.permute.xlu0 %754 }
 0x171   : > { %888 = vst [vmem:[%s1212_s20 + $0x50] sm:$0xff] %v856_v10  ;;  %v837_v27 = vmul.f32 %v1523_v42, %v755_v61 }
 0x173   : > { %v869_v56 = vadd.f32 %v837_v27, %v1436_v1  ;;  %v751_v50 = vpop.permute.xlu2 %750  ;;  %v711_v63 = vpop.permute.xlu1 %710 }
 0x174   : > { %v836_v5 = vmul.f32 %v1523_v42, %v751_v50  ;;  %v826_v22 = vmul.f32 %v1523_v42, %v711_v63 }
 0x175   : > { %901 = vst [vmem:[%s1212_s20 + $0xb8] sm:$0xff] %v869_v56 }
 0x176   : > { %v868_v41 = vadd.f32 %v836_v5, %v1426_v18  ;;  %v858_v49 = vadd.f32 %v826_v22, %v1428_v62 }
 0x178   : > { %900 = vst [vmem:[%s1212_s20 + $0xb0] sm:$0xff] %v868_v41  ;;  %v767_v4 = vpop.permute.xlu0 %766 }
 0x179   : > { %890 = vst [vmem:[%s1212_s20 + $0x60] sm:$0xff] %v858_v49  ;;  %v840_v3 = vmul.f32 %v1523_v42, %v767_v4 }
 0x17b   : > { %v872_v1 = vadd.f32 %v840_v3, %v1454_v48  ;;  %v763_v43 = vpop.permute.xlu2 %762  ;;  %v723_v44 = vpop.permute.xlu1 %722 }
 0x17c   : > { %v839_v31 = vmul.f32 %v1523_v42, %v763_v43  ;;  %v829_v29 = vmul.f32 %v1523_v42, %v723_v44 }
 0x17d   : > { %904 = vst [vmem:[%s1212_s20 + $0xd0] sm:$0xff] %v872_v1 }
 0x17e   : > { %v871_v18 = vadd.f32 %v839_v31, %v1444_v21  ;;  %v861_v62 = vadd.f32 %v829_v29, %v1446_v16 }
 0x180   : > { %903 = vst [vmem:[%s1212_s20 + $0xc8] sm:$0xff] %v871_v18  ;;  %v779_v40 = vpop.permute.xlu0 %778 }
 0x181   : > { %893 = vst [vmem:[%s1212_s20 + $0x78] sm:$0xff] %v861_v62  ;;  %v843_v52 = vmul.f32 %v1523_v42, %v779_v40 }
 0x183   : > { %v875_v48 = vadd.f32 %v843_v52, %v1471_v57  ;;  %v775_v8 = vpop.permute.xlu2 %774  ;;  %v735_v55 = vpop.permute.xlu1 %734 }
 0x184   : > { %v842_v11 = vmul.f32 %v1523_v42, %v775_v8  ;;  %v832_v25 = vmul.f32 %v1523_v42, %v735_v55 }
 0x185   : > { %907 = vst [vmem:[%s1212_s20 + $0xe8] sm:$0xff] %v875_v48 }
 0x186   : > { %v874_v21 = vadd.f32 %v842_v11, %v1462_v35  ;;  %v864_v16 = vadd.f32 %v832_v25, %v1464_v23 }
 0x188   : > { %906 = vst [vmem:[%s1212_s20 + $0xe0] sm:$0xff] %v874_v21  ;;  %v791_v36 = vpop.permute.xlu0 %790 }
 0x189   : > { %896 = vst [vmem:[%s1212_s20 + $0x90] sm:$0xff] %v864_v16  ;;  %v846_v13 = vmul.f32 %v1523_v42, %v791_v36 }
 0x18b   : > { %v878_v57 = vadd.f32 %v846_v13, %v1488_v60  ;;  %v787_v53 = vpop.permute.xlu2 %786  ;;  %v747_v9 = vpop.permute.xlu1 %746 }
 0x18c   : > { %v845_v34 = vmul.f32 %v1523_v42, %v787_v53  ;;  %v835_v47 = vmul.f32 %v1523_v42, %v747_v9 }
 0x18d   : > { %910 = vst [vmem:[%s1212_s20 + $0x100] sm:$0xff] %v878_v57 }
 0x18e   : > { %v877_v35 = vadd.f32 %v845_v34, %v1479_v28  ;;  %v867_v23 = vadd.f32 %v835_v47, %v1481_v17 }
 0x190   : > { %909 = vst [vmem:[%s1212_s20 + $0xf8] sm:$0xff] %v877_v35  ;;  %v803_v39 = vpop.permute.xlu0 %802 }
 0x191   : > { %899 = vst [vmem:[%s1212_s20 + $0xa8] sm:$0xff] %v867_v23  ;;  %v849_v24 = vmul.f32 %v1523_v42, %v803_v39 }
 0x193   : > { %v881_v60 = vadd.f32 %v849_v24, %v1505_v30  ;;  %v799_v58 = vpop.permute.xlu2 %798  ;;  %v759_v59 = vpop.permute.xlu1 %758 }
 0x194   : > { %v848_v46 = vmul.f32 %v1523_v42, %v799_v58  ;;  %v838_v0 = vmul.f32 %v1523_v42, %v759_v59 }
 0x195   : > { %913 = vst [vmem:[%s1212_s20 + $0x118] sm:$0xff] %v881_v60 }
 0x196   : > { %v880_v28 = vadd.f32 %v848_v46, %v1496_v32  ;;  %v870_v17 = vadd.f32 %v838_v0, %v1498_v20 }
 0x198   : > { %912 = vst [vmem:[%s1212_s20 + $0x110] sm:$0xff] %v880_v28  ;;  %v815_v37 = vpop.permute.xlu0 %814 }
 0x199   : > { %902 = vst [vmem:[%s1212_s20 + $0xc0] sm:$0xff] %v870_v17  ;;  %v852_v30 = vmul.f32 %v1523_v42, %v815_v37 }
 0x19b   : > { %v884_v6 = vadd.f32 %v852_v30, %v1526_v19  ;;  %v811_v12 = vpop.permute.xlu2 %810  ;;  %v771_v15 = vpop.permute.xlu1 %770 }
 0x19c   : > { %v851_v7 = vmul.f32 %v1523_v42, %v811_v12  ;;  %v841_v38 = vmul.f32 %v1523_v42, %v771_v15 }
 0x19d   : > { %916 = vst [vmem:[%s1212_s20 + $0x130] sm:$0xff] %v884_v6 }
 0x19e   : > { %v883_v32 = vadd.f32 %v851_v7, %v1513_v33  ;;  %v873_v20 = vadd.f32 %v841_v38, %v1515_v54 }
 0x1a0   : > { %915 = vst [vmem:[%s1212_s20 + $0x128] sm:$0xff] %v883_v32 }
 0x1a1   : > { %905 = vst [vmem:[%s1212_s20 + $0xd8] sm:$0xff] %v873_v20 }
 0x1a3   : > { %v783_v51 = vpop.permute.xlu1 %782 }
 0x1a4   : > { %v844_v10 = vmul.f32 %v1523_v42, %v783_v51 }
 0x1a6   : > { %v876_v19 = vadd.f32 %v844_v10, %v1532_v26 }
 0x1a8   : > { %908 = vst [vmem:[%s1212_s20 + $0xf0] sm:$0xff] %v876_v19 }
 0x1ab   : > { %v795_v61 = vpop.permute.xlu1 %794 }
 0x1ac   : > { %v847_v27 = vmul.f32 %v1523_v42, %v795_v61 }
 0x1ae   : > { %v879_v56 = vadd.f32 %v847_v27, %v1543_v45 }
 0x1b0   : > { %911 = vst [vmem:[%s1212_s20 + $0x108] sm:$0xff] %v879_v56 }
 0x1b3   : > { %v807_v50 = vpop.permute.xlu1 %806 }
 0x1b4   : > { %v850_v33 = vmul.f32 %v1523_v42, %v807_v50 }
 0x1b6   : > { %v882_v54 = vadd.f32 %v850_v33, %v1554_v14 }
 0x1b8   : > { %914 = vst [vmem:[%s1212_s20 + $0x120] sm:$0xff] %v882_v54 }
 0x1bb   : > { %v819_v63 = vpop.permute.xlu1 %818 }
 0x1bc   : > { %v853_v5 = vmul.f32 %v1523_v42, %v819_v63 }
 0x1be   : > { %v885_v22 = vadd.f32 %v853_v5, %v1565_v2 }
 0x1c0   : > { %917 = vst [vmem:[%s1212_s20 + $0x138] sm:$0xff] %v885_v22 }
 0x1c1 PF: > { %s12_s9 = sadd.s32 1, %s1017_s9  }
 0x1c2   : > { %p9_p4 = scmp.ge.s32.totalorder %s12_s9, 4  }
 0x1c4   :  { %11 = sbr.rel (!%p9_p4) target bundleno = 1 (0x1), region = 58 }

</bundles_post_ra>
